<compile_context>
chip_gen: v7x
topology: tpu7x:2x2x1
jax: 0.10.0
libtpu: 0.0.40
codegen_flags: <defaults>
</compile_context>

<pallas_src>
import functools

import jax
import jax.numpy as jnp
from jax import lax
from jax.experimental import pallas as pl
from jax.experimental.pallas import tpu as pltpu

LANE = 128


def linear_kernel(x_ref, w_ref, b_ref, o_ref):
    # x: [B, K], w: [N_pad, K] (native PyTorch layout), b: [1, N_pad]
    # Contract over K (last axis of both) -> [B, N_pad]; MXU accumulates in f32.
    acc = lax.dot_general(
        x_ref[...], w_ref[...],
        dimension_numbers=(((1,), (1,)), ((), ())),
        preferred_element_type=jnp.float32,
    )
    o_ref[...] = (acc + b_ref[...]).astype(o_ref.dtype)


def prepare_params(weight, bias):
    """One-time parameter prep: pad N up to a multiple of 128 for lane-dense
    stores inside the kernel. weight: [N, K], bias: [N]."""
    n, k = weight.shape
    n_pad = max(LANE, ((n + LANE - 1) // LANE) * LANE)
    w_pad = jnp.zeros((n_pad, k), weight.dtype).at[:n, :].set(weight)
    b_pad = jnp.zeros((1, n_pad), bias.dtype).at[0, :n].set(bias)
    return w_pad, b_pad


@functools.partial(jax.jit, static_argnames=("num_class",))
def linear_forward(x, w_pad, b_pad, *, num_class):
    """x: [B, K] f32, w_pad: [N_pad, K] f32, b_pad: [1, N_pad] f32."""
    b, k = x.shape
    n_pad = w_pad.shape[0]

    cost = pl.CostEstimate(
        flops=2 * b * k * n_pad,
        transcendentals=0,
        bytes_accessed=4 * (b * k + n_pad * k + n_pad + b * n_pad),
    )

    out_padded = pl.pallas_call(
        linear_kernel,
        out_shape=jax.ShapeDtypeStruct((b, n_pad), x.dtype),
        in_specs=[
            pl.BlockSpec(memory_space=pltpu.MemorySpace.VMEM),  # x
            pl.BlockSpec(memory_space=pltpu.MemorySpace.VMEM),  # weight [N_pad, K]
            pl.BlockSpec(memory_space=pltpu.MemorySpace.VMEM),  # bias   [1, N_pad]
        ],
        out_specs=pl.BlockSpec(memory_space=pltpu.MemorySpace.VMEM),
        cost_estimate=cost,
    )(x, w_pad, b_pad)

    # Slice the lane padding back off (fused into the surrounding jit).
    return out_padded[:, :num_class]


# TODO(synk): if this layer is ever run at production sizes, tile the batch axis
# with (8,128)-aligned blocks sized for v7x's 64 MiB VMEM and mark it "parallel".


if __name__ == "__main__":
    # Small shapes implied by the module: args['input_shape']=32, num_class=16
    batch = 8
    in_features = 32
    num_class = 16

    key = jax.random.PRNGKey(0)
    kx, kw, kb = jax.random.split(key, 3)

    x = jax.random.normal(kx, (batch, in_features), dtype=jnp.float32)
    # Deterministic init mimicking nn.Linear (uniform in +-1/sqrt(fan_in))
    bound = 1.0 / (in_features ** 0.5)
    weight = jax.random.uniform(kw, (num_class, in_features),
                                minval=-bound, maxval=bound, dtype=jnp.float32)
    bias = jax.random.uniform(kb, (num_class,),
                              minval=-bound, maxval=bound, dtype=jnp.float32)

    # One-time parameter prep (equivalent to doing this at module init).
    w_pad, b_pad = prepare_params(weight, bias)

    out = linear_forward(x, w_pad, b_pad, num_class=num_class)
    jax.block_until_ready(out)

    # Correctness check against plain JAX reference
    ref = x @ weight.T + bias
    assert out.shape == (batch, num_class)
    assert jnp.allclose(out, ref, atol=1e-5, rtol=1e-5)

    print("KERNEL_OK")
</pallas_src>

<mosaic_0001>
module attributes {stable_mosaic.version = 11 : i64} {
  func.func @linear_kernel(%arg0: memref<8x32xf32, #tpu.memory_space<vmem>>, %arg1: memref<128x32xf32, #tpu.memory_space<vmem>>, %arg2: memref<1x128xf32, #tpu.memory_space<vmem>>, %arg3: memref<8x128xf32, #tpu.memory_space<vmem>>) attributes {dimension_semantics = [], scalar_prefetch = 0 : i64, scratch_operands = 0 : i64, tpu.core_type = #tpu.core_type<tc>} {
    %c0 = arith.constant 0 : index
    %c0_0 = arith.constant 0 : index
    %0 = vector.load %arg0[%c0, %c0_0] : memref<8x32xf32, #tpu.memory_space<vmem>>, vector<8x32xf32>
    %c0_1 = arith.constant 0 : index
    %c0_2 = arith.constant 0 : index
    %1 = vector.load %arg1[%c0_1, %c0_2] : memref<128x32xf32, #tpu.memory_space<vmem>>, vector<128x32xf32>
    %cst = arith.constant dense<0.000000e+00> : vector<8x128xf32>
    %2 = tpu.matmul %0, %1, %cst {dimension_numbers = #tpu.dot_dimension_numbers<[1], [1], [0], [0], [0, 0, 1, 0], [], []>} : vector<8x32xf32>, vector<128x32xf32>, vector<8x128xf32> -> vector<8x128xf32>
    %c0_3 = arith.constant 0 : index
    %c0_4 = arith.constant 0 : index
    %3 = vector.load %arg2[%c0_3, %c0_4] : memref<1x128xf32, #tpu.memory_space<vmem>>, vector<1x128xf32>
    %4 = vector.broadcast %3 : vector<1x128xf32> to vector<8x128xf32>
    %5 = arith.addf %2, %4 : vector<8x128xf32>
    %c0_5 = arith.constant 0 : index
    %c0_6 = arith.constant 0 : index
    %6 = vector.load %arg3[%c0_5, %c0_6] : memref<8x128xf32, #tpu.memory_space<vmem>>, vector<8x128xf32>
    tpu.vector_store %arg3[%c0_5, %c0_6], %5 {strides = array<i32>} : memref<8x128xf32, #tpu.memory_space<vmem>>, vector<8x128xf32>,
    return
  }
}

</mosaic_0001>

<bundles_post_ra>
// kernel: linear_forward.1
= control target key start
LH: loop header
LB: loop body
LE: loop exit
PB: predicated region body
PF: predicated region fallthrough
CT: control target
= control target key end

     0   :  { %vm39_vm0 = vcmask 261120   ;;  %v306_v2 = vmov 0.0|0.0   ;;  %vm307_vm2 = vmmov 0   ;;  %v308_v5 = vmov 0.0   ;;  %s419_s0 = inlined_call_operand.vmem [shape: f32[8,32], index: 0, kind: input, shape index: {}]   ;;  %s420_s1 = inlined_call_operand.vmem [shape: f32[128,32], index: 1, kind: input, shape index: {}]   ;;  %s421_s2 = inlined_call_operand.vmem [shape: f32[1,128], index: 2, kind: input, shape index: {}]   ;;  %s422_s3 = inlined_call_operand.hbm [shape: f32[8,128], index: 3, kind: output, shape index: {}]  }
   0x1   :  { %v16_v0 = vld [vmem:[%s420_s1] sm:$0xff]  ;;  %v17_v1 = vld [vmem:[%s420_s1 + $0x8] sm:$0xff]  ;;  %246 = vmatprep.subr.bf16.mxu0 %v306_v2  ;;  %vm338_vm1 = vmpackc.low %vm39_vm0, %vm39_vm0  ;;  %243 = vmatprep.mubr.msk.f32.mxu0 %vm307_vm2, %v308_v5 }
   0x2   :  { %v247_v3 = vpack.c.bf16 %v17_v1, %v16_v0  ;;  %v18_v6 = vld [vmem:[%s420_s1 + $0x10] sm:$0xff]  ;;  %v19_v7 = vld [vmem:[%s420_s1 + $0x18] sm:$0xff] }
   0x4   :  { %249 = vmatpush3.bf16.xpose.msk.msra.mxu0 %vm338_vm1, %v247_v3 }
   0x5   :  { %250 = vmatprep.subr.bf16.mxu0 %v306_v2 }
   0x6   :  { %8 = vsyncpa [#allocation3], 0  ;;  %v251_v8 = vpack.c.bf16 %v19_v7, %v18_v6  ;;  %v20_v9 = vld [vmem:[%s420_s1 + $0x20] sm:$0xff]  ;;  %v21_v10 = vld [vmem:[%s420_s1 + $0x28] sm:$0xff]  ;;  %s309_s21 = smov [#allocation2]  }
   0x7   :  { %v255_v11 = vpack.c.bf16 %v21_v10, %v20_v9  ;;  %v22_v12 = vld [vmem:[%s420_s1 + $0x30] sm:$0xff]  ;;  %v23_v13 = vld [vmem:[%s420_s1 + $0x38] sm:$0xff]  ;;  %v24_v15 = vld [vmem:[%s420_s1 + $0x40] sm:$0xff]  ;;  %s168_s22 = sshll.u32 %s309_s21, 4  ;;  %s169_s22 = int_to_ptr.vmem [resolvable:$true] %s168_s22 }
   0x8   :  { %v259_v14 = vpack.c.bf16 %v23_v13, %v22_v12  ;;  %v25_v16 = vld [vmem:[%s420_s1 + $0x48] sm:$0xff]  ;;  %v26_v18 = vld [vmem:[%s420_s1 + $0x50] sm:$0xff]  ;;  %v27_v19 = vld [vmem:[%s420_s1 + $0x58] sm:$0xff]  ;;  %p287_p1 = scmp.lt.s32.totalorder %s169_s22, %s169_s22 }
   0x9   :  { %v263_v17 = vpack.c.bf16 %v25_v16, %v24_v15  ;;  %v267_v20 = vpack.c.bf16 %v27_v19, %v26_v18  ;;  %v28_v21 = vld [vmem:[%s420_s1 + $0x60] sm:$0xff]  ;;  %v29_v22 = vld [vmem:[%s420_s1 + $0x68] sm:$0xff]  ;;  %v30_v24 = vld [vmem:[%s420_s1 + $0x70] sm:$0xff] }
   0xa   :  { %v271_v23 = vpack.c.bf16 %v29_v22, %v28_v21  ;;  %v31_v25 = vld [vmem:[%s420_s1 + $0x78] sm:$0xff]  ;;  %v15_v27 = vld [vmem:[%s419_s0] sm:$0xff]  ;;  %s282_s1 = scalar_lea.vmem %s169_s22, 128 }
   0xb   :  { %v275_v26 = vpack.c.bf16 %v31_v25, %v30_v24  ;;  %v176_v28 = vld [vmem:[%s421_s2] ss:$0 sm:$0xff]  ;;  %p283_p0 = scmp.ne.s32.totalorder %s169_s22, %s282_s1  ;;  %p288_p2 = scmp.lt.s32.totalorder %s282_s1, %s282_s1 }
   0xc   :  { %253 = vmatpush3.bf16.xpose.msk.msra.mxu0 %vm338_vm1, %v251_v8 }
   0xd   :  { %254 = vmatprep.subr.bf16.mxu0 %v306_v2  ;;  %p289_p3 = por %p288_p2, %p287_p1 }
   0xf   :  { %p290_p4 = pnand %p289_p3, %p283_p0 }
  0x14   :  { %257 = vmatpush3.bf16.xpose.msk.msra.mxu0 %vm338_vm1, %v255_v11 }
  0x15   :  { %258 = vmatprep.subr.bf16.mxu0 %v306_v2 }
  0x1c   :  { %261 = vmatpush3.bf16.xpose.msk.msra.mxu0 %vm338_vm1, %v259_v14 }
  0x1d   :  { %262 = vmatprep.subr.bf16.mxu0 %v306_v2 }
  0x24   :  { %265 = vmatpush3.bf16.xpose.msk.msra.mxu0 %vm338_vm1, %v263_v17 }
  0x25   :  { %266 = vmatprep.subr.bf16.mxu0 %v306_v2 }
  0x2c   :  { %269 = vmatpush3.bf16.xpose.msk.msra.mxu0 %vm338_vm1, %v267_v20 }
  0x2d   :  { %270 = vmatprep.subr.bf16.mxu0 %v306_v2 }
  0x34   :  { %273 = vmatpush3.bf16.xpose.msk.msra.mxu0 %vm338_vm1, %v271_v23 }
  0x35   :  { %274 = vmatprep.subr.bf16.mxu0 %v306_v2 }
  0x3c   :  { %277 = vmatpush3.bf16.xpose.msk.msra.mxu0 %vm338_vm1, %v275_v26 }
  0x43   :  { %244 = vmatmul.mubr.msk.f32.vlgmr.msra.gmra.mrb[0].mxu0 %vm39_vm0, %v15_v27 }
 0x116   :  { %v157_v29 = vpop.f32.mrb[0].mxu0 }
 0x117   :  { %v158_v30 = vadd.f32 %v176_v28, %v157_v29  ;;  %v245_v31 = vpop.f32.mrb[1].mxu0 }
 0x119   :  { %161 = vst [vmem:[#allocation2] sm:$0xff] %v158_v30 }
 0x11a   :  { %293 = shalt.err (!%p290_p4)
}
 0x11b   :  { %s294_s24 = scalar_lea.hbm %s422_s3, 128 }
 0x11c   :  { %p295_p5 = scmp.ne.s32.totalorder %s422_s3, %s294_s24  ;;  %p298_p6 = scmp.lt.u32.totalorder %s294_s24, %s422_s3 }
 0x11e   :  { %p300_p7 = pnand %p298_p6, %p295_p5 }
 0x120   :  { %303 = shalt.err (!%p300_p7)
}
 0x121   :  { %171 = dma.vmem_to_hbm [thread:$0]  %s169_s22, 128, %s422_s3, [#allocation3]  }
 0x122   :  { %304 = dma.done.wait [#allocation3], 128  }
 0x123   :  { %305 = vsyncadd [#allocation3], 4294967168 }
 0x124   :  { %175 = vsyncpa [#allocation3], 1 }

</bundles_post_ra>
